<compile_context>
chip_gen: v6e
topology: v6e:2x2x1
jax: 0.10.0
libtpu: 0.0.40
codegen_flags: <defaults>
</compile_context>

<pallas_src>
import jax
import jax.numpy as jnp
from jax.experimental import pallas as pl
from jax.experimental.pallas import tpu as pltpu

LANES = 128           # padded feature width inside the kernel (lane axis)
NUM_LAYERS = 5
MAX_TILE_ROWS = 4096  # cap on batch-tile rows per grid step


def _mlp_kernel(x_ref, w_ref, b_ref, o_ref, h_scratch):
    """x_ref: (TB,S) f32; w_ref: (5,128,128) bf16 resident; b_ref: (8,128) f32
    resident; o_ref: (TB,A) f32; h_scratch: (TB,128) f32 VMEM."""
    state_dim = x_ref.shape[1]
    action_dim = o_ref.shape[1]

    # Zero-pad the real state lanes into a lane-dense 128-wide VMEM scratch.
    # Re-zeroed every grid step (cheap; scratch is per-core so a one-time init
    # gated on program_id would be wrong under megacore).
    h_scratch[...] = jnp.zeros_like(h_scratch)
    h_scratch[:, :state_dim] = x_ref[...]
    h = h_scratch[...]

    # Layers 0..3: Linear + ReLU (statically unrolled; bf16 MXU, f32 accumulate).
    for i in range(NUM_LAYERS - 1):
        w = w_ref[i]                       # (128,128) bf16, static-index view
        b = b_ref[pl.ds(i, 1), :]          # (1,128) f32
        h = jnp.dot(h.astype(jnp.bfloat16), w,
                    preferred_element_type=jnp.float32) + b
        h = jnp.maximum(h, 0.0)

    # Layer 4: Linear + Tanh; only the real action lanes are computed/stored.
    w = w_ref[NUM_LAYERS - 1]
    b = b_ref[pl.ds(NUM_LAYERS - 1, 1), :]
    h = jnp.dot(h.astype(jnp.bfloat16), w,
                preferred_element_type=jnp.float32) + b
    o_ref[...] = jnp.tanh(h[:, :action_dim]).astype(o_ref.dtype)


def pack_params(params):
    """Pack per-layer (W:(in,out), b:(out,)) into padded resident slabs.

    Returns:
      w_packed: (5, 128, 128) bf16, zero-padded.
      b_packed: (8, 128) f32, rows 0..4 hold biases, rest zero (sublane pad).
    """
    w_packed = jnp.zeros((NUM_LAYERS, LANES, LANES), jnp.bfloat16)
    b_packed = jnp.zeros((8, LANES), jnp.float32)
    for i, (w, b) in enumerate(params):
        fin, fout = w.shape
        w_packed = w_packed.at[i, :fin, :fout].set(w.astype(jnp.bfloat16))
        b_packed = b_packed.at[i, :fout].set(b.reshape(-1).astype(jnp.float32))
    return w_packed, b_packed


def _choose_tile(batch):
    """Balanced, sublane-aligned batch tile; >=2 tiles for v7x megacore."""
    num_tiles = max(1, -(-batch // MAX_TILE_ROWS))
    if batch > 16:
        num_tiles = max(num_tiles, 2)        # split across both v7x TensorCores
    tile_rows = -(-batch // num_tiles)       # balance the last tile
    tile_rows = ((tile_rows + 7) // 8) * 8   # sublane align
    if tile_rows >= batch:
        tile_rows = batch                    # whole batch in one block (legal: equals dim)
    grid_rows = -(-batch // tile_rows)
    return tile_rows, grid_rows


def model_t1_forward(x, w_packed, b_packed, action_dim):
    """Fused MLP forward. x: (batch, state_dim) f32 -> (batch, action_dim) f32."""
    batch, state_dim = x.shape
    tile_rows, grid_rows = _choose_tile(batch)

    return pl.pallas_call(
        _mlp_kernel,
        out_shape=jax.ShapeDtypeStruct((batch, action_dim), jnp.float32),
        grid_spec=pltpu.PrefetchScalarGridSpec(
            num_scalar_prefetch=0,
            grid=(grid_rows,),
            in_specs=[
                # Unpadded x tiles: last dim equals the full array dim (state_dim).
                pl.BlockSpec((tile_rows, state_dim), lambda i: (i, 0)),
                # Resident, non-pipelined whole-array operands in VMEM.
                pl.BlockSpec(memory_space=pltpu.MemorySpace.VMEM),   # W slab
                pl.BlockSpec(memory_space=pltpu.MemorySpace.VMEM),   # b slab
            ],
            # Unpadded output tiles: last dim equals the full array dim (action_dim).
            out_specs=pl.BlockSpec((tile_rows, action_dim), lambda i: (i, 0)),
            scratch_shapes=[pltpu.VMEM((tile_rows, LANES), jnp.float32)],
        ),
        compiler_params=pltpu.CompilerParams(
            dimension_semantics=("parallel",),
        ),
    )(x.astype(jnp.float32), w_packed, b_packed)


def init_params(state_dim, action_dim, hidden_dim, key):
    """Deterministic init matching Model_t1's nn.Sequential layer shapes.

    Weights stored as (in, out) == transpose of PyTorch's (out, in) Linear weight.
    """
    dims = [state_dim, hidden_dim, hidden_dim, hidden_dim // 2, hidden_dim // 4,
            action_dim]
    params = []
    for i in range(NUM_LAYERS):
        key, kw, kb = jax.random.split(key, 3)
        fan_in, fan_out = dims[i], dims[i + 1]
        bound = 1.0 / jnp.sqrt(fan_in)
        w = jax.random.uniform(kw, (fan_in, fan_out), jnp.float32, -bound, bound)
        b = jax.random.uniform(kb, (fan_out,), jnp.float32, -bound, bound)
        params.append((w, b))
    return params


def reference_forward(x, params, bf16=False):
    """Plain-JAX reference. bf16=True mirrors the kernel's bf16-MXU math."""
    h = x
    for i, (w, b) in enumerate(params):
        if bf16:
            h = jnp.dot(h.astype(jnp.bfloat16), w.astype(jnp.bfloat16),
                        preferred_element_type=jnp.float32) + b[None, :]
        else:
            h = h @ w + b[None, :]
        if i < NUM_LAYERS - 1:
            h = jnp.maximum(h, 0.0)
    return jnp.tanh(h)


if __name__ == "__main__":
    # The MLP consumes cat(x[:3], u[:3]) -> state_dim = 6; hidden_dim = 32;
    # action_dim = 3; small batch = 2.
    state_dim, action_dim, hidden_dim = 6, 3, 32
    batch = 2

    key = jax.random.PRNGKey(0)
    key, kx = jax.random.split(key)
    x = jax.random.normal(kx, (batch, state_dim), dtype=jnp.float32)

    params = init_params(state_dim, action_dim, hidden_dim, key)
    w_packed, b_packed = pack_params(params)   # one-time packed-slab setup

    out = model_t1_forward(x, w_packed, b_packed, action_dim)
    out = jax.block_until_ready(out)

    ref_bf16 = reference_forward(x, params, bf16=True)   # same math as kernel
    ref_f32 = reference_forward(x, params, bf16=False)   # module semantics

    assert out.shape == (batch, action_dim)
    assert jnp.allclose(out, ref_bf16, atol=2e-3, rtol=2e-3), "mismatch vs bf16 ref"
    assert jnp.allclose(out, ref_f32, atol=5e-2, rtol=5e-2), "mismatch vs f32 ref"

    # TODO(synk): g_function_eval / g_tilde_eval / limit_g are scalar,
    # data-dependent host-side helpers (Python branching on norms), not part of
    # forward(); left out of the kernel.

    print("KERNEL_OK")
</pallas_src>

<mosaic_0001>
module attributes {stable_mosaic.version = 11 : i64} {
  func.func @_mlp_kernel(%arg0: i32, %arg1: memref<2x6xf32, #tpu.memory_space<vmem>>, %arg2: memref<5x128x128xbf16, #tpu.memory_space<vmem>>, %arg3: memref<8x128xf32, #tpu.memory_space<vmem>>, %arg4: memref<2x3xf32, #tpu.memory_space<vmem>>, %arg5: memref<2x128xf32, #tpu.memory_space<vmem>>) attributes {dimension_semantics = [#tpu.dimension_semantics<parallel>], iteration_bounds = array<i64: 1>, scalar_prefetch = 0 : i64, scratch_operands = 1 : i64, tpu.core_type = #tpu.core_type<tc>, window_params = [{transform_indices = @transform_0, window_bounds = array<i64: 2, 6>}, {pipeline_mode = #tpu.pipeline_mode<synchronous>, transform_indices = @transform_1, window_bounds = array<i64: 5, 128, 128>}, {pipeline_mode = #tpu.pipeline_mode<synchronous>, transform_indices = @transform_2, window_bounds = array<i64: 8, 128>}, {transform_indices = @transform_3, window_bounds = array<i64: 2, 3>}]} {
    %cst = arith.constant 0.000000e+00 : f32
    %0 = vector.broadcast %cst : f32 to vector<2x128xf32>
    %c0 = arith.constant 0 : index
    %c0_0 = arith.constant 0 : index
    %1 = vector.load %arg5[%c0, %c0_0] : memref<2x128xf32, #tpu.memory_space<vmem>>, vector<2x128xf32>
    tpu.vector_store %arg5[%c0, %c0_0], %0 {strides = array<i32>} : memref<2x128xf32, #tpu.memory_space<vmem>>, vector<2x128xf32>,
    %c0_1 = arith.constant 0 : index
    %c0_2 = arith.constant 0 : index
    %2 = vector.load %arg1[%c0_1, %c0_2] : memref<2x6xf32, #tpu.memory_space<vmem>>, vector<2x6xf32>
    %c0_3 = arith.constant 0 : index
    %c0_4 = arith.constant 0 : index
    %3 = vector.load %arg5[%c0_3, %c0_4] : memref<2x128xf32, #tpu.memory_space<vmem>>, vector<2x6xf32>
    tpu.vector_store %arg5[%c0_3, %c0_4], %2 {strides = array<i32>} : memref<2x128xf32, #tpu.memory_space<vmem>>, vector<2x6xf32>,
    %c0_5 = arith.constant 0 : index
    %c0_6 = arith.constant 0 : index
    %4 = vector.load %arg5[%c0_5, %c0_6] : memref<2x128xf32, #tpu.memory_space<vmem>>, vector<2x128xf32>
    %c0_7 = arith.constant 0 : index
    %c0_8 = arith.constant 0 : index
    %c0_9 = arith.constant 0 : index
    %5 = vector.load %arg2[%c0_7, %c0_8, %c0_9] : memref<5x128x128xbf16, #tpu.memory_space<vmem>>, vector<1x128x128xbf16>
    %6 = vector.shape_cast %5 : vector<1x128x128xbf16> to vector<128x128xbf16>
    %c0_10 = arith.constant 0 : index
    %c0_11 = arith.constant 0 : index
    %7 = vector.load %arg3[%c0_10, %c0_11] : memref<8x128xf32, #tpu.memory_space<vmem>>, vector<1x128xf32>
    %8 = arith.truncf %4 : vector<2x128xf32> to vector<2x128xbf16>
    %cst_12 = arith.constant dense<0.000000e+00> : vector<2x128xf32>
    %9 = tpu.matmul %8, %6, %cst_12 {dimension_numbers = #tpu.dot_dimension_numbers<[1], [0], [0], [1], [0, 0, 1, 1], [], []>} : vector<2x128xbf16>, vector<128x128xbf16>, vector<2x128xf32> -> vector<2x128xf32>
    %10 = vector.broadcast %7 : vector<1x128xf32> to vector<2x128xf32>
    %11 = arith.addf %9, %10 : vector<2x128xf32>
    %cst_13 = arith.constant 0.000000e+00 : f32
    %12 = vector.broadcast %cst_13 : f32 to vector<2x128xf32>
    %13 = arith.maximumf %11, %12 : vector<2x128xf32>
    %c1 = arith.constant 1 : index
    %c0_14 = arith.constant 0 : index
    %c0_15 = arith.constant 0 : index
    %14 = vector.load %arg2[%c1, %c0_14, %c0_15] : memref<5x128x128xbf16, #tpu.memory_space<vmem>>, vector<1x128x128xbf16>
    %15 = vector.shape_cast %14 : vector<1x128x128xbf16> to vector<128x128xbf16>
    %c1_16 = arith.constant 1 : index
    %c0_17 = arith.constant 0 : index
    %16 = vector.load %arg3[%c1_16, %c0_17] : memref<8x128xf32, #tpu.memory_space<vmem>>, vector<1x128xf32>
    %17 = arith.truncf %13 : vector<2x128xf32> to vector<2x128xbf16>
    %cst_18 = arith.constant dense<0.000000e+00> : vector<2x128xf32>
    %18 = tpu.matmul %17, %15, %cst_18 {dimension_numbers = #tpu.dot_dimension_numbers<[1], [0], [0], [1], [0, 0, 1, 1], [], []>} : vector<2x128xbf16>, vector<128x128xbf16>, vector<2x128xf32> -> vector<2x128xf32>
    %19 = vector.broadcast %16 : vector<1x128xf32> to vector<2x128xf32>
    %20 = arith.addf %18, %19 : vector<2x128xf32>
    %cst_19 = arith.constant 0.000000e+00 : f32
    %21 = vector.broadcast %cst_19 : f32 to vector<2x128xf32>
    %22 = arith.maximumf %20, %21 : vector<2x128xf32>
    %c2 = arith.constant 2 : index
    %c0_20 = arith.constant 0 : index
    %c0_21 = arith.constant 0 : index
    %23 = vector.load %arg2[%c2, %c0_20, %c0_21] : memref<5x128x128xbf16, #tpu.memory_space<vmem>>, vector<1x128x128xbf16>
    %24 = vector.shape_cast %23 : vector<1x128x128xbf16> to vector<128x128xbf16>
    %c2_22 = arith.constant 2 : index
    %c0_23 = arith.constant 0 : index
    %25 = vector.load %arg3[%c2_22, %c0_23] : memref<8x128xf32, #tpu.memory_space<vmem>>, vector<1x128xf32>
    %26 = arith.truncf %22 : vector<2x128xf32> to vector<2x128xbf16>
    %cst_24 = arith.constant dense<0.000000e+00> : vector<2x128xf32>
    %27 = tpu.matmul %26, %24, %cst_24 {dimension_numbers = #tpu.dot_dimension_numbers<[1], [0], [0], [1], [0, 0, 1, 1], [], []>} : vector<2x128xbf16>, vector<128x128xbf16>, vector<2x128xf32> -> vector<2x128xf32>
    %28 = vector.broadcast %25 : vector<1x128xf32> to vector<2x128xf32>
    %29 = arith.addf %27, %28 : vector<2x128xf32>
    %cst_25 = arith.constant 0.000000e+00 : f32
    %30 = vector.broadcast %cst_25 : f32 to vector<2x128xf32>
    %31 = arith.maximumf %29, %30 : vector<2x128xf32>
    %c3 = arith.constant 3 : index
    %c0_26 = arith.constant 0 : index
    %c0_27 = arith.constant 0 : index
    %32 = vector.load %arg2[%c3, %c0_26, %c0_27] : memref<5x128x128xbf16, #tpu.memory_space<vmem>>, vector<1x128x128xbf16>
    %33 = vector.shape_cast %32 : vector<1x128x128xbf16> to vector<128x128xbf16>
    %c3_28 = arith.constant 3 : index
    %c0_29 = arith.constant 0 : index
    %34 = vector.load %arg3[%c3_28, %c0_29] : memref<8x128xf32, #tpu.memory_space<vmem>>, vector<1x128xf32>
    %35 = arith.truncf %31 : vector<2x128xf32> to vector<2x128xbf16>
    %cst_30 = arith.constant dense<0.000000e+00> : vector<2x128xf32>
    %36 = tpu.matmul %35, %33, %cst_30 {dimension_numbers = #tpu.dot_dimension_numbers<[1], [0], [0], [1], [0, 0, 1, 1], [], []>} : vector<2x128xbf16>, vector<128x128xbf16>, vector<2x128xf32> -> vector<2x128xf32>
    %37 = vector.broadcast %34 : vector<1x128xf32> to vector<2x128xf32>
    %38 = arith.addf %36, %37 : vector<2x128xf32>
    %cst_31 = arith.constant 0.000000e+00 : f32
    %39 = vector.broadcast %cst_31 : f32 to vector<2x128xf32>
    %40 = arith.maximumf %38, %39 : vector<2x128xf32>
    %c4 = arith.constant 4 : index
    %c0_32 = arith.constant 0 : index
    %c0_33 = arith.constant 0 : index
    %41 = vector.load %arg2[%c4, %c0_32, %c0_33] : memref<5x128x128xbf16, #tpu.memory_space<vmem>>, vector<1x128x128xbf16>
    %42 = vector.shape_cast %41 : vector<1x128x128xbf16> to vector<128x128xbf16>
    %c4_34 = arith.constant 4 : index
    %c0_35 = arith.constant 0 : index
    %43 = vector.load %arg3[%c4_34, %c0_35] : memref<8x128xf32, #tpu.memory_space<vmem>>, vector<1x128xf32>
    %44 = arith.truncf %40 : vector<2x128xf32> to vector<2x128xbf16>
    %cst_36 = arith.constant dense<0.000000e+00> : vector<2x128xf32>
    %45 = tpu.matmul %44, %42, %cst_36 {dimension_numbers = #tpu.dot_dimension_numbers<[1], [0], [0], [1], [0, 0, 1, 1], [], []>} : vector<2x128xbf16>, vector<128x128xbf16>, vector<2x128xf32> -> vector<2x128xf32>
    %46 = vector.broadcast %43 : vector<1x128xf32> to vector<2x128xf32>
    %47 = arith.addf %45, %46 : vector<2x128xf32>
    %48 = vector.extract_strided_slice %47 {offsets = [0, 0], sizes = [2, 3], strides = [1, 1]} : vector<2x128xf32> to vector<2x3xf32>
    %49 = math.tanh %48 : vector<2x3xf32>
    %c0_37 = arith.constant 0 : index
    %c0_38 = arith.constant 0 : index
    %50 = vector.load %arg4[%c0_37, %c0_38] : memref<2x3xf32, #tpu.memory_space<vmem>>, vector<2x3xf32>
    tpu.vector_store %arg4[%c0_37, %c0_38], %49 {strides = array<i32>} : memref<2x3xf32, #tpu.memory_space<vmem>>, vector<2x3xf32>,
    return
  }
  func.func @transform_0(%arg0: i32) -> (i32, i32) {
    %c0_i32 = arith.constant 0 : i32
    %c0_i32_0 = arith.constant 0 : i32
    return %arg0, %c0_i32 : i32, i32
  }
  func.func @transform_1(%arg0: i32) -> (i32, i32, i32) {
    %c0_i32 = arith.constant 0 : i32
    %c0_i32_0 = arith.constant 0 : i32
    %c0_i32_1 = arith.constant 0 : i32
    %c0_i32_2 = arith.constant 0 : i32
    return %c0_i32, %c0_i32_0, %c0_i32_1 : i32, i32, i32
  }
  func.func @transform_2(%arg0: i32) -> (i32, i32) {
    %c0_i32 = arith.constant 0 : i32
    %c0_i32_0 = arith.constant 0 : i32
    %c0_i32_1 = arith.constant 0 : i32
    return %c0_i32, %c0_i32_0 : i32, i32
  }
  func.func @transform_3(%arg0: i32) -> (i32, i32) {
    %c0_i32 = arith.constant 0 : i32
    %c0_i32_0 = arith.constant 0 : i32
    return %arg0, %c0_i32 : i32, i32
  }
}

</mosaic_0001>

<bundles_post_ra>
// kernel: tpu_custom_call.1
= control target key start
LH: loop header
LB: loop body
LE: loop exit
PB: predicated region body
PF: predicated region fallthrough
CT: control target
= control target key end

     0   :  { %8 = vsyncpa [#allocation4], 0  ;;  %s1052_s0 = inlined_call_operand.hbm [shape: f32[2,6], index: 0, kind: input, shape index: {}]   ;;  %s1053_s1 = inlined_call_operand.hbm [shape: bf16[5,128,128], index: 1, kind: input, shape index: {}]   ;;  %s1054_s2 = inlined_call_operand.hbm [shape: f32[8,128], index: 2, kind: input, shape index: {}]   ;;  %s1055_s3 = inlined_call_operand.hbm [shape: f32[2,3], index: 3, kind: output, shape index: {}]  }
   0x1   :  { %9 = vsyncpa [#allocation7], 0 }
   0x2   :  { %10 = vsyncpa [#allocation5], 0  ;;  %s961_s12 = smov [#allocation6]  }
   0x3   :  { %s26_s13 = sshll.u32 %s961_s12, 4  ;;  %s27_s13 = int_to_ptr.vmem [resolvable:$true] %s26_s13 }
   0x4   :  { %s883_s14 = scalar_lea.vmem %s27_s13, 5120  ;;  %p888_p1 = scmp.lt.s32.totalorder %s27_s13, %s27_s13 }
   0x5   :  { %p884_p0 = scmp.ne.s32.totalorder %s27_s13, %s883_s14  ;;  %p889_p2 = scmp.lt.s32.totalorder %s883_s14, %s883_s14 }
   0x7   :  { %p890_p3 = por %p889_p2, %p888_p1 }
   0x9   :  { %p891_p4 = pnand %p890_p3, %p884_p0 }
   0xb   :  { %894 = shalt.err (!%p891_p4)
}
   0xc   :  { %s962_s15 = smov 64   ;;  %s963_s16 = smov 4  }
   0xd   :  { %32 = dma.hbm_to_vmem [thread:$0]  %s1053_s1, 5120, %s27_s13, [#allocation7], %s962_s15, %s962_s15, %s963_s16  }
   0xe   :  { %s964_s19 = smov [#allocation3]   ;;  %s965_s21 = smov [#allocation8]  }
   0xf   :  { %s17_s20 = sshll.u32 %s964_s19, 4  ;;  %s39_s22 = sshll.u32 %s965_s21, 4  ;;  %s18_s20 = int_to_ptr.vmem [resolvable:$true] %s17_s20  ;;  %s40_s22 = int_to_ptr.vmem [resolvable:$true] %s39_s22 }
  0x10   :  { %s903_s23 = scalar_lea.vmem %s18_s20, 32  ;;  %p908_p6 = scmp.lt.s32.totalorder %s18_s20, %s18_s20 }
  0x11   :  { %p904_p5 = scmp.ne.s32.totalorder %s18_s20, %s903_s23  ;;  %p909_p7 = scmp.lt.s32.totalorder %s903_s23, %s903_s23 }
  0x13   :  { %p910_p8 = por %p909_p7, %p908_p6 }
  0x15   :  { %p911_p9 = pnand %p910_p8, %p904_p5 }
  0x17   :  { %914 = shalt.err (!%p911_p9)
}
  0x18   :  { %20 = dma.hbm_to_vmem [thread:$0]  %s1052_s0, 32, %s18_s20, [#allocation4]  }
  0x19   :  { %s923_s26 = scalar_lea.vmem %s40_s22, 128  ;;  %p928_p11 = scmp.lt.s32.totalorder %s40_s22, %s40_s22 }
  0x1a   :  { %p924_p10 = scmp.ne.s32.totalorder %s40_s22, %s923_s26  ;;  %p929_p12 = scmp.lt.s32.totalorder %s923_s26, %s923_s26 }
  0x1c   :  { %p930_p13 = por %p929_p12, %p928_p11 }
  0x1e   :  { %p931_p0 = pnand %p930_p13, %p924_p10 }
  0x20   :  { %934 = shalt.err (!%p931_p0)
}
  0x21   :  { %42 = dma.hbm_to_vmem [thread:$0]  %s1054_s2, 128, %s40_s22, [#allocation7]  }
  0x22   :  { %955 = dma.done.wait [#allocation4], 32  }
  0x23   :  { %956 = vsyncadd [#allocation4], 4294967264 }
  0x24   :  { %957 = dma.done.wait [#allocation7], 5248  }
  0x25   :  { %958 = vsyncadd [#allocation7], 4294962048  ;;  %v966_v0 = vmov 0.0   ;;  %vm967_vm0 = vmmov 0   ;;  %v833_v1 = vld [vmem:[#allocation6 + $0x38] sm:$0xff]   ;;  %v834_v2 = vld [vmem:[#allocation6 + $0x30] sm:$0xff]  }
  0x26   :  { %725 = vmatprep.subr.bf16.mxu0 %v966_v0  ;;  %53 = vst [vmem:[#allocation2] sm:$0x3] %v966_v0  ;;  %741 = vmatprep.mubr.msk.bf16.mxu0 %vm967_vm0, %v966_v0  ;;  %v835_v3 = vld [vmem:[#allocation6 + $0x28] sm:$0xff]   ;;  %vm55_vm1 = vcmask 41984   ;;  %v54_v4 = vld [vmem:[#allocation3] sm:$0x3] }
  0x27   :  { %745 = vmatprep.subr.bf16.mxu1 %v966_v0  ;;  %761 = vmatprep.mubr.msk.bf16.mxu1 %vm967_vm0, %v966_v0  ;;  %56 = vst.msk [vmem:[#allocation2] sm:$0x3] %vm55_vm1, %v54_v4  ;;  %v841_v5 = vld [vmem:[#allocation6 + $0x78] sm:$0xff]   ;;  %v836_v6 = vld [vmem:[#allocation6 + $0x20] sm:$0xff]   ;;  %v842_v7 = vld [vmem:[#allocation6 + $0x70] sm:$0xff]   ;;  %s968_s0 = smov [#allocation9]  }
  0x28   :  { %726 = vmatpush3.bf16.msra.mxu0 %v833_v1  ;;  %746 = vmatpush3.bf16.msra.mxu1 %v841_v5  ;;  %v837_v8 = vld [vmem:[#allocation6 + $0x18] sm:$0xff]   ;;  %v843_v9 = vld [vmem:[#allocation6 + $0x68] sm:$0xff]   ;;  %v838_v10 = vld [vmem:[#allocation6 + $0x10] sm:$0xff]   ;;  %s625_s2 = sshll.u32 %s968_s0, 4  ;;  %vm617_vm2 = vcmask 17408   ;;  %s626_s2 = int_to_ptr.vmem [resolvable:$true] %s625_s2 }
  0x29   :  { %727 = vmatprep.subr.bf16.mxu0 %v966_v0  ;;  %747 = vmatprep.subr.bf16.mxu1 %v966_v0  ;;  %v844_v11 = vld [vmem:[#allocation6 + $0x60] sm:$0xff]   ;;  %v839_v12 = vld [vmem:[#allocation6 + $0x8] sm:$0xff]   ;;  %v845_v13 = vld [vmem:[#allocation6 + $0x58] sm:$0xff]   ;;  %s935_s28 = scalar_lea.vmem %s626_s2, 32  ;;  %p940_p2 = scmp.lt.s32.totalorder %s626_s2, %s626_s2 }
  0x2a   :  { %v840_v14 = vld [vmem:[#allocation6] sm:$0xff]   ;;  %v846_v16 = vld [vmem:[#allocation6 + $0x50] sm:$0xff]   ;;  %v847_v18 = vld [vmem:[#allocation6 + $0x48] sm:$0xff]   ;;  %p936_p1 = scmp.ne.s32.totalorder %s626_s2, %s935_s28  ;;  %p941_p3 = scmp.lt.s32.totalorder %s935_s28, %s935_s28 }
  0x2b   :  { %v848_v19 = vld [vmem:[#allocation6 + $0x40] sm:$0xff]   ;;  %v849_v20 = vld [vmem:[#allocation6 + $0xb8] sm:$0xff]   ;;  %v850_v21 = vld [vmem:[#allocation6 + $0xb0] sm:$0xff]  }
  0x2c   :  { %728 = vmatpush3.bf16.msra.mxu0 %v834_v2  ;;  %748 = vmatpush3.bf16.msra.mxu1 %v842_v7  ;;  %v851_v22 = vld [vmem:[#allocation6 + $0xa8] sm:$0xff]   ;;  %v852_v23 = vld [vmem:[#allocation6 + $0xa0] sm:$0xff]   ;;  %v853_v24 = vld [vmem:[#allocation6 + $0x98] sm:$0xff]   ;;  %p942_p4 = por %p941_p3, %p940_p2 }
  0x2d   :  { %729 = vmatprep.subr.bf16.mxu0 %v966_v0  ;;  %749 = vmatprep.subr.bf16.mxu1 %v966_v0  ;;  %v854_v25 = vld [vmem:[#allocation6 + $0x90] sm:$0xff]   ;;  %v635_v26 = vld [vmem:[#allocation8] ss:$0 sm:$0xff]  ;;  %v855_v34 = vld [vmem:[#allocation6 + $0x88] sm:$0xff]  }
  0x2e   :  { %v57_v15 = vld [vmem:[#allocation2] sm:$0x3]  ;;  %v856_v35 = vld [vmem:[#allocation6 + $0x80] sm:$0xff]   ;;  %v858_v37 = vld [vmem:[#allocation6 + $0xf0] sm:$0xff]   ;;  %p943_p5 = pnand %p942_p4, %p936_p1 }
  0x2f   :  { %v75_v17 = vpack.c.bf16 %v57_v15, %v57_v15  ;;  %v857_v36 = vld [vmem:[#allocation6 + $0xf8] sm:$0xff]   ;;  %v859_v38 = vld [vmem:[#allocation6 + $0xe8] sm:$0xff]   ;;  %v860_v39 = vld [vmem:[#allocation6 + $0xe0] sm:$0xff]  }
  0x30   :  { %730 = vmatpush3.bf16.msra.mxu0 %v835_v3  ;;  %750 = vmatpush3.bf16.msra.mxu1 %v843_v9  ;;  %v861_v40 = vld [vmem:[#allocation6 + $0xd8] sm:$0xff]   ;;  %v862_v41 = vld [vmem:[#allocation6 + $0xd0] sm:$0xff]   ;;  %v644_v42 = vld [vmem:[#allocation8 + $0x1] ss:$0 sm:$0xff] }
  0x31   :  { %731 = vmatprep.subr.bf16.mxu0 %v966_v0  ;;  %751 = vmatprep.subr.bf16.mxu1 %v966_v0  ;;  %v863_v50 = vld [vmem:[#allocation6 + $0xc8] sm:$0xff]   ;;  %v864_v51 = vld [vmem:[#allocation6 + $0xc0] sm:$0xff]   ;;  %v865_v52 = vld [vmem:[#allocation6 + $0x138] sm:$0xff]  }
  0x32   :  { %v866_v53 = vld [vmem:[#allocation6 + $0x130] sm:$0xff]   ;;  %v867_v54 = vld [vmem:[#allocation6 + $0x128] sm:$0xff]   ;;  %v868_v55 = vld [vmem:[#allocation6 + $0x120] sm:$0xff]  }
  0x33   :  { %v869_v56 = vld [vmem:[#allocation6 + $0x118] sm:$0xff]   ;;  %v870_v57 = vld [vmem:[#allocation6 + $0x110] sm:$0xff]   ;;  %v653_v58 = vld [vmem:[#allocation8 + $0x2] ss:$0 sm:$0xff] }
  0x34   :  { %732 = vmatpush3.bf16.msra.mxu0 %v836_v6  ;;  %752 = vmatpush3.bf16.msra.mxu1 %v844_v11  ;;  %v871_v3 = vld [vmem:[#allocation6 + $0x108] sm:$0xff]   ;;  %v872_v4 = vld [vmem:[#allocation6 + $0x100] sm:$0xff]  }
  0x35   :  { %733 = vmatprep.subr.bf16.mxu0 %v966_v0  ;;  %753 = vmatprep.subr.bf16.mxu1 %v966_v0  ;;  %v662_v5 = vld [vmem:[#allocation8 + $0x3] ss:$0 sm:$0xff] }
  0x38   :  { %734 = vmatpush3.bf16.msra.mxu0 %v837_v8  ;;  %754 = vmatpush3.bf16.msra.mxu1 %v845_v13  ;;  %v671_v13 = vld [vmem:[#allocation8 + $0x4] ss:$0 sm:$0xff] }
  0x39   :  { %735 = vmatprep.subr.bf16.mxu0 %v966_v0  ;;  %755 = vmatprep.subr.bf16.mxu1 %v966_v0 }
  0x3c   :  { %736 = vmatpush3.bf16.msra.mxu0 %v838_v10  ;;  %756 = vmatpush3.bf16.msra.mxu1 %v846_v16 }
  0x3d   :  { %737 = vmatprep.subr.bf16.mxu0 %v966_v0  ;;  %757 = vmatprep.subr.bf16.mxu1 %v966_v0 }
  0x40   :  { %738 = vmatpush3.bf16.msra.mxu0 %v839_v12  ;;  %758 = vmatpush3.bf16.msra.mxu1 %v847_v18 }
  0x41   :  { %739 = vmatprep.subr.bf16.mxu0 %v966_v0  ;;  %759 = vmatprep.subr.bf16.mxu1 %v966_v0 }
  0x44   :  { %740 = vmatpush3.bf16.msra.mxu0 %v840_v14  ;;  %760 = vmatpush3.bf16.msra.mxu1 %v848_v19 }
  0x45   :  { %765 = vmatprep.subr.bf16.mxu0 %v966_v0  ;;  %785 = vmatprep.subr.bf16.mxu1 %v966_v0 }
  0x47   :  { %742 = vmatmul.mubr.bf16.vlgmr.msra.gmra.mxu0 %v75_v17 }
  0x48   :  { %781 = vmatprep.mubr.msk.bf16.mxu0 %vm967_vm0, %v966_v0  ;;  %766 = vmatpush3.bf16.msra.mxu0 %v849_v20 }
  0x49   :  { %767 = vmatprep.subr.bf16.mxu0 %v966_v0 }
  0x4c   :  { %768 = vmatpush3.bf16.msra.mxu0 %v850_v21 }
  0x4d   :  { %769 = vmatprep.subr.bf16.mxu0 %v966_v0 }
  0x50   :  { %770 = vmatpush3.bf16.msra.mxu0 %v851_v22 }
  0x51   :  { %771 = vmatprep.subr.bf16.mxu0 %v966_v0 }
  0x54   :  { %772 = vmatpush3.bf16.msra.mxu0 %v852_v23 }
  0x55   :  { %773 = vmatprep.subr.bf16.mxu0 %v966_v0 }
  0x58   :  { %774 = vmatpush3.bf16.msra.mxu0 %v853_v24 }
  0x59   :  { %775 = vmatprep.subr.bf16.mxu0 %v966_v0 }
  0x5c   :  { %776 = vmatpush3.bf16.msra.mxu0 %v854_v25 }
  0x5d   :  { %777 = vmatprep.subr.bf16.mxu0 %v966_v0 }
  0x60   :  { %778 = vmatpush3.bf16.msra.mxu0 %v855_v34 }
  0x61   :  { %779 = vmatprep.subr.bf16.mxu0 %v966_v0 }
  0x64   :  { %780 = vmatpush3.bf16.msra.mxu0 %v856_v35 }
  0x65   :  { %805 = vmatprep.subr.bf16.mxu0 %v966_v0 }
 0x107   :  { %v162_v27 = vpop.f32.mrf.mxu0 }
 0x108   :  { %v163_v28 = vadd.f32 %v635_v26, %v162_v27 }
 0x109   :  { %v743_v29 = vpop.f32.mrf.mxu0 }
 0x10a   :  { %v168_v30 = vmax.f32 %v163_v28, 0.0 }
 0x10b   :  { %v165_v31 = vpop.f32.mrf.mxu0 }
 0x10c   :  { %v187_v32 = vpack.c.bf16 %v168_v30, %v168_v30 }
 0x10d   :  { %v744_v33 = vpop.f32.mrf.mxu0 }
 0x10e   :  { %762 = vmatmul.mubr.bf16.vlgmr.msra.gmra.mxu1 %v187_v32 }
 0x10f   :  { %801 = vmatprep.mubr.msk.bf16.mxu1 %vm967_vm0, %v966_v0  ;;  %786 = vmatpush3.bf16.msra.mxu1 %v857_v36 }
 0x110   :  { %787 = vmatprep.subr.bf16.mxu1 %v966_v0 }
 0x113   :  { %788 = vmatpush3.bf16.msra.mxu1 %v858_v37 }
 0x114   :  { %789 = vmatprep.subr.bf16.mxu1 %v966_v0 }
 0x117   :  { %790 = vmatpush3.bf16.msra.mxu1 %v859_v38 }
 0x118   :  { %791 = vmatprep.subr.bf16.mxu1 %v966_v0 }
 0x11b   :  { %792 = vmatpush3.bf16.msra.mxu1 %v860_v39 }
 0x11c   :  { %793 = vmatprep.subr.bf16.mxu1 %v966_v0 }
 0x11f   :  { %794 = vmatpush3.bf16.msra.mxu1 %v861_v40 }
 0x120   :  { %795 = vmatprep.subr.bf16.mxu1 %v966_v0 }
 0x123   :  { %796 = vmatpush3.bf16.msra.mxu1 %v862_v41 }
 0x124   :  { %797 = vmatprep.subr.bf16.mxu1 %v966_v0 }
 0x127   :  { %798 = vmatpush3.bf16.msra.mxu1 %v863_v50 }
 0x128   :  { %799 = vmatprep.subr.bf16.mxu1 %v966_v0 }
 0x12b   :  { %800 = vmatpush3.bf16.msra.mxu1 %v864_v51 }
 0x1ce   :  { %v274_v43 = vpop.f32.mrf.mxu1 }
 0x1cf   :  { %v275_v44 = vadd.f32 %v644_v42, %v274_v43 }
 0x1d0   :  { %v763_v45 = vpop.f32.mrf.mxu1 }
 0x1d1   :  { %v280_v46 = vmax.f32 %v275_v44, 0.0 }
 0x1d2   :  { %v277_v47 = vpop.f32.mrf.mxu1 }
 0x1d3   :  { %v299_v48 = vpack.c.bf16 %v280_v46, %v280_v46 }
 0x1d4   :  { %v764_v49 = vpop.f32.mrf.mxu1 }
 0x1d5   :  { %782 = vmatmul.mubr.bf16.vlgmr.msra.gmra.mxu0 %v299_v48 }
 0x1d6   :  { %821 = vmatprep.mubr.msk.bf16.mxu0 %vm967_vm0, %v966_v0  ;;  %806 = vmatpush3.bf16.msra.mxu0 %v865_v52 }
 0x1d7   :  { %807 = vmatprep.subr.bf16.mxu0 %v966_v0 }
 0x1da   :  { %808 = vmatpush3.bf16.msra.mxu0 %v866_v53 }
 0x1db   :  { %809 = vmatprep.subr.bf16.mxu0 %v966_v0 }
 0x1de   :  { %810 = vmatpush3.bf16.msra.mxu0 %v867_v54 }
 0x1df   :  { %811 = vmatprep.subr.bf16.mxu0 %v966_v0 }
 0x1e2   :  { %812 = vmatpush3.bf16.msra.mxu0 %v868_v55 }
 0x1e3   :  { %813 = vmatprep.subr.bf16.mxu0 %v966_v0 }
 0x1e6   :  { %814 = vmatpush3.bf16.msra.mxu0 %v869_v56 }
 0x1e7   :  { %815 = vmatprep.subr.bf16.mxu0 %v966_v0 }
 0x1ea   :  { %816 = vmatpush3.bf16.msra.mxu0 %v870_v57 }
 0x1eb   :  { %817 = vmatprep.subr.bf16.mxu0 %v966_v0 }
 0x1ee   :  { %818 = vmatpush3.bf16.msra.mxu0 %v871_v3 }
 0x1ef   :  { %819 = vmatprep.subr.bf16.mxu0 %v966_v0 }
 0x1f2   :  { %820 = vmatpush3.bf16.msra.mxu0 %v872_v4 }
 0x295   :  { %v386_v59 = vpop.f32.mrf.mxu0 }
 0x296   :  { %v387_v60 = vadd.f32 %v653_v58, %v386_v59 }
 0x297   :  { %v783_v61 = vpop.f32.mrf.mxu0 }
 0x298   :  { %v392_v62 = vmax.f32 %v387_v60, 0.0 }
 0x299   :  { %v389_v63 = vpop.f32.mrf.mxu0 }
 0x29a   :  { %v411_v1 = vpack.c.bf16 %v392_v62, %v392_v62 }
 0x29b   :  { %v784_v2 = vpop.f32.mrf.mxu0 }
 0x29c   :  { %802 = vmatmul.mubr.bf16.vlgmr.msra.gmra.mxu1 %v411_v1 }
 0x35c   :  { %v498_v6 = vpop.f32.mrf.mxu1 }
 0x35d   :  { %v499_v7 = vadd.f32 %v662_v5, %v498_v6 }
 0x35e   :  { %v803_v8 = vpop.f32.mrf.mxu1 }
 0x35f   :  { %v504_v9 = vmax.f32 %v499_v7, 0.0 }
 0x360   :  { %v501_v10 = vpop.f32.mrf.mxu1 }
 0x361   :  { %v523_v11 = vpack.c.bf16 %v504_v9, %v504_v9 }
 0x362   :  { %v804_v12 = vpop.f32.mrf.mxu1 }
 0x363   :  { %822 = vmatmul.mubr.bf16.vlgmr.msra.gmra.mxu0 %v523_v11 }
 0x423   :  { %v610_v14 = vpop.f32.mrf.mxu0 }
 0x424   :  { %v611_v15 = vadd.f32 %v671_v13, %v610_v14 }
 0x425   :  { %v823_v16 = vpop.f32.mrf.mxu0 }
 0x426   :  { %873 = vtanh.f32 %v611_v15 }
 0x427   :  { %v613_v17 = vpop.f32.mrf.mxu0 }
 0x429   :  { %v824_v18 = vpop.f32.mrf.mxu0 }
 0x433   :  { %v874_v0 = vpop.eup %873 }
 0x434   :  { %618 = vst.msk [vmem:[#allocation9] sm:$0x3] %vm617_vm2, %v874_v0 }
 0x435   :  { %946 = shalt.err (!%p943_p5)
}
 0x436   :  { %628 = dma.vmem_to_hbm [thread:$0]  %s626_s2, 32, %s1055_s3, [#allocation5]  }
 0x437   :  { %959 = dma.done.wait [#allocation5], 32  }
 0x438   :  { %960 = vsyncadd [#allocation5], 4294967264 }
 0x439   :  { %632 = vsyncpa [#allocation4], 1 }
 0x43a   :  { %633 = vsyncpa [#allocation7], 1 }
 0x43b   :  { %634 = vsyncpa [#allocation5], 1 }

</bundles_post_ra>
